<compile_context>
chip_gen: v7x
topology: tpu7x:2x2x1
jax: 0.10.0
libtpu: 0.0.40
codegen_flags: <defaults>
</compile_context>

<pallas_src>
import functools

import jax
import jax.numpy as jnp
from jax.experimental import pallas as pl
from jax.experimental.pallas import tpu as pltpu


def _round_up(n: int, m: int) -> int:
    return ((n + m - 1) // m) * m


def _mlp_kernel(x_ref, w1_ref, b1_ref, w2_ref, b2_ref, w3_ref, b3_ref, o_ref,
                *, softmax: bool):
    """Fused 3-layer MLP on one (tb, in_dim) row tile. Weights VMEM-resident."""
    x = x_ref[...]                                   # (tb, in_dim)  f32
    w1 = w1_ref[...]                                 # (in_dim, h1)  f32
    in_dim = x.shape[1]

    # ---- layer 1: (tb, in_dim) x (in_dim, h1) + b1, ReLU ----
    if in_dim <= 8:
        # in_dim is tiny (4 here): a degenerate-K MXU matmul wastes the
        # systolic array; do in_dim broadcast-FMAs on the VPU instead.
        h1 = x[:, 0:1] * w1[0:1, :]
        for k in range(1, in_dim):
            h1 = h1 + x[:, k:k + 1] * w1[k:k + 1, :]
    else:
        h1 = jnp.dot(x, w1, preferred_element_type=jnp.float32)
    h1 = jnp.maximum(h1 + b1_ref[...], 0.0)

    # ---- layer 2: (tb, h1) @ (h1, h2) + b2, ReLU (f32 accumulation) ----
    w2 = w2_ref[...]                                 # f32 or bf16 (wrapper-cast)
    h2 = jnp.dot(h1.astype(w2.dtype), w2, preferred_element_type=jnp.float32)
    h2 = jnp.maximum(h2 + b2_ref[...], 0.0)          # bias/ReLU stay f32 (VPU)

    # ---- layer 3: (tb, h2) @ (h2, out_dim) + b3 ----
    w3 = w3_ref[...]
    out = jnp.dot(h2.astype(w3.dtype), w3, preferred_element_type=jnp.float32)
    out = out + b3_ref[...]

    if softmax:
        # Output kept at its true width (no padded logit columns), so a plain
        # numerically-stable softmax suffices.  Padded *batch* rows see finite
        # bias-driven logits (no NaN) and are sliced off in the wrapper.
        m = jnp.max(out, axis=-1, keepdims=True)
        e = jnp.exp(out - m)
        out = e * pl.reciprocal(jnp.sum(e, axis=-1, keepdims=True), approx=True)

    o_ref[...] = out.astype(o_ref.dtype)


def prepare_params(params, *, bf16_matmul: bool = False):
    """One-time parameter prep, hoisted out of the forward path.

    With bf16_matmul=True the layer-2/3 weights are cast to bf16 ONCE here
    (instead of every grid step inside the kernel), halving their VMEM
    residency and HBM/DMA bytes.  Biases stay f32 (VPU math stays f32)."""
    if not bf16_matmul:
        return dict(params)
    p = dict(params)
    p["w2"] = params["w2"].astype(jnp.bfloat16)
    p["w3"] = params["w3"].astype(jnp.bfloat16)
    return p


def mlp_forward(x, params, *, softmax: bool = False, tb: int = 2048):
    """x: (B, in_dim) f32. params: w1,b1,w2,b2,w3,b3 with (fan_in, fan_out)
    weights (PyTorch weight.T) and (1, fan_out) biases."""
    w1, b1 = params["w1"], params["b1"]
    w2, b2 = params["w2"], params["b2"]
    w3, b3 = params["w3"], params["b3"]

    B, in_dim = x.shape
    h1_dim = w1.shape[1]
    h2_dim = w2.shape[1]
    out_dim = w3.shape[1]

    # Row tile: multiple of 8 (f32 sublanes).  Keep >= 2 grid steps whenever
    # the batch can be split so v7x's second TensorCore gets work under
    # dimension_semantics=("parallel",); cap at `tb` (default 2048) to bound
    # VMEM while amortizing the ~0.35us/step grid overhead for large B.
    B8 = _round_up(max(B, 1), 8)
    half = _round_up((B8 + 1) // 2, 8) if B8 > 8 else B8
    tb_eff = max(8, min(tb, half))
    B_pad = _round_up(B, tb_eff)
    n_steps = B_pad // tb_eff

    x = x.astype(jnp.float32)
    if B_pad != B:
        x = jnp.pad(x, ((0, B_pad - B), (0, 0)))     # rows only; no lane padding

    kernel = functools.partial(_mlp_kernel, softmax=softmax)

    flops = 2 * B_pad * (in_dim * h1_dim + h1_dim * h2_dim + h2_dim * out_dim)
    transcendentals = B_pad * out_dim if softmax else 0
    bytes_accessed = (4 * B_pad * (in_dim + out_dim)
                      + w1.size * w1.dtype.itemsize
                      + w2.size * w2.dtype.itemsize
                      + w3.size * w3.dtype.itemsize
                      + 4 * (h1_dim + h2_dim + out_dim))

    const = lambda i: (0, 0)   # weights/biases stay VMEM-resident across steps

    out = pl.pallas_call(
        kernel,
        out_shape=jax.ShapeDtypeStruct((B_pad, out_dim), jnp.float32),
        grid=(n_steps,),
        in_specs=[
            pl.BlockSpec((tb_eff, in_dim), lambda i: (i, 0)),  # x: unpadded rows
            pl.BlockSpec(w1.shape, const),                     # w1 (in_dim, h1)
            pl.BlockSpec(b1.shape, const),                     # b1 (1, h1)
            pl.BlockSpec(w2.shape, const),                     # w2 (h1, h2)
            pl.BlockSpec(b2.shape, const),                     # b2 (1, h2)
            pl.BlockSpec(w3.shape, const),                     # w3 (h2, out)
            pl.BlockSpec(b3.shape, const),                     # b3 (1, out)
        ],
        out_specs=pl.BlockSpec((tb_eff, out_dim), lambda i: (i, 0)),
        compiler_params=pltpu.CompilerParams(
            dimension_semantics=("parallel",)),                # v7x: 2 TCs
        cost_estimate=pl.CostEstimate(flops=flops,
                                      transcendentals=transcendentals,
                                      bytes_accessed=bytes_accessed),
    )(x, w1, b1, w2, b2, w3, b3)

    return out[:B]


def init_params(key, in_dim=1, out_dim=1, hidden_dim=128):
    """Deterministic init mimicking nn.Linear (uniform +-1/sqrt(fan_in))."""
    ks = jax.random.split(key, 6)

    def linear(kw, kb, fan_in, fan_out):
        bound = 1.0 / jnp.sqrt(fan_in)
        # Stored directly as (fan_in, fan_out) == PyTorch weight.T
        w = jax.random.uniform(kw, (fan_in, fan_out), jnp.float32, -bound, bound)
        b = jax.random.uniform(kb, (1, fan_out), jnp.float32, -bound, bound)
        return w, b

    w1, b1 = linear(ks[0], ks[1], in_dim, hidden_dim)
    w2, b2 = linear(ks[2], ks[3], hidden_dim, 64)
    w3, b3 = linear(ks[4], ks[5], 64, out_dim)
    return {"w1": w1, "b1": b1, "w2": w2, "b2": b2, "w3": w3, "b3": b3}


def _ref_forward(x, p, softmax=False):
    h1 = jnp.maximum(x @ p["w1"] + p["b1"], 0.0)
    h2 = jnp.maximum(h1 @ p["w2"] + p["b2"], 0.0)
    out = h2 @ p["w3"] + p["b3"]
    if softmax:
        out = jax.nn.softmax(out, axis=-1)
    return out


if __name__ == "__main__":
    key = jax.random.PRNGKey(0)
    k_param, k_x1, k_x2 = jax.random.split(key, 3)

    in_dim, out_dim, hidden_dim = 4, 2, 128
    params = init_params(k_param, in_dim=in_dim, out_dim=out_dim,
                         hidden_dim=hidden_dim)

    # --- case 1: tiny batch, no softmax, full f32 ---
    x_small = jax.random.normal(k_x1, (8, in_dim), dtype=jnp.float32)
    y = jax.block_until_ready(mlp_forward(x_small, params, softmax=False))
    y_ref = _ref_forward(x_small, params, softmax=False)
    assert y.shape == (8, out_dim)
    assert jnp.allclose(y, y_ref, atol=1e-4, rtol=1e-4), "f32 no-softmax mismatch"

    # --- case 2: non-multiple batch (row padding, 2 grid steps), softmax ---
    x_mid = jax.random.normal(k_x2, (200, in_dim), dtype=jnp.float32)
    y_sm = jax.block_until_ready(mlp_forward(x_mid, params, softmax=True))
    y_sm_ref = _ref_forward(x_mid, params, softmax=True)
    assert y_sm.shape == (200, out_dim)
    assert jnp.allclose(y_sm, y_sm_ref, atol=2e-3, rtol=2e-3), "softmax mismatch"

    # --- case 3: bf16 weights prepared once in the wrapper (v5e/v6e/v7x MXU) ---
    params_bf16 = prepare_params(params, bf16_matmul=True)
    y_bf = jax.block_until_ready(mlp_forward(x_mid, params_bf16, softmax=False))
    y_bf_ref = _ref_forward(x_mid, params, softmax=False)
    assert jnp.allclose(y_bf, y_bf_ref, atol=2e-2, rtol=2e-2), "bf16 mismatch"

    # TODO(synk): Model.predict's numpy<->torch device shuttling is host-side
    # glue, not a kernel op; call mlp_forward on a jnp array instead.
    print("KERNEL_OK")
</pallas_src>

<mosaic_0001>
module attributes {stable_mosaic.version = 11 : i64} {
  func.func @_mlp_kernel(%arg0: i32, %arg1: memref<8x4xf32, #tpu.memory_space<vmem>>, %arg2: memref<4x128xf32, #tpu.memory_space<vmem>>, %arg3: memref<1x128xf32, #tpu.memory_space<vmem>>, %arg4: memref<128x64xf32, #tpu.memory_space<vmem>>, %arg5: memref<1x64xf32, #tpu.memory_space<vmem>>, %arg6: memref<64x2xf32, #tpu.memory_space<vmem>>, %arg7: memref<1x2xf32, #tpu.memory_space<vmem>>, %arg8: memref<8x2xf32, #tpu.memory_space<vmem>>) attributes {dimension_semantics = [#tpu.dimension_semantics<parallel>], iteration_bounds = array<i64: 1>, scalar_prefetch = 0 : i64, scratch_operands = 0 : i64, tpu.core_type = #tpu.core_type<tc>, window_params = [{transform_indices = @transform_0, window_bounds = array<i64: 8, 4>}, {pipeline_mode = #tpu.pipeline_mode<synchronous>, transform_indices = @transform_1, window_bounds = array<i64: 4, 128>}, {pipeline_mode = #tpu.pipeline_mode<synchronous>, transform_indices = @transform_2, window_bounds = array<i64: 1, 128>}, {pipeline_mode = #tpu.pipeline_mode<synchronous>, transform_indices = @transform_3, window_bounds = array<i64: 128, 64>}, {pipeline_mode = #tpu.pipeline_mode<synchronous>, transform_indices = @transform_4, window_bounds = array<i64: 1, 64>}, {pipeline_mode = #tpu.pipeline_mode<synchronous>, transform_indices = @transform_5, window_bounds = array<i64: 64, 2>}, {pipeline_mode = #tpu.pipeline_mode<synchronous>, transform_indices = @transform_6, window_bounds = array<i64: 1, 2>}, {transform_indices = @transform_7, window_bounds = array<i64: 8, 2>}]} {
    %c0 = arith.constant 0 : index
    %c0_0 = arith.constant 0 : index
    %0 = vector.load %arg1[%c0, %c0_0] : memref<8x4xf32, #tpu.memory_space<vmem>>, vector<8x4xf32>
    %c0_1 = arith.constant 0 : index
    %c0_2 = arith.constant 0 : index
    %1 = vector.load %arg2[%c0_1, %c0_2] : memref<4x128xf32, #tpu.memory_space<vmem>>, vector<4x128xf32>
    %2 = vector.extract_strided_slice %0 {offsets = [0, 0], sizes = [8, 1], strides = [1, 1]} : vector<8x4xf32> to vector<8x1xf32>
    %3 = vector.extract_strided_slice %1 {offsets = [0, 0], sizes = [1, 128], strides = [1, 1]} : vector<4x128xf32> to vector<1x128xf32>
    %4 = vector.broadcast %2 : vector<8x1xf32> to vector<8x128xf32>
    %5 = vector.broadcast %3 : vector<1x128xf32> to vector<8x128xf32>
    %6 = arith.mulf %4, %5 : vector<8x128xf32>
    %7 = vector.extract_strided_slice %0 {offsets = [0, 1], sizes = [8, 1], strides = [1, 1]} : vector<8x4xf32> to vector<8x1xf32>
    %8 = vector.extract_strided_slice %1 {offsets = [1, 0], sizes = [1, 128], strides = [1, 1]} : vector<4x128xf32> to vector<1x128xf32>
    %9 = vector.broadcast %7 : vector<8x1xf32> to vector<8x128xf32>
    %10 = vector.broadcast %8 : vector<1x128xf32> to vector<8x128xf32>
    %11 = arith.mulf %9, %10 : vector<8x128xf32>
    %12 = arith.addf %6, %11 : vector<8x128xf32>
    %13 = vector.extract_strided_slice %0 {offsets = [0, 2], sizes = [8, 1], strides = [1, 1]} : vector<8x4xf32> to vector<8x1xf32>
    %14 = vector.extract_strided_slice %1 {offsets = [2, 0], sizes = [1, 128], strides = [1, 1]} : vector<4x128xf32> to vector<1x128xf32>
    %15 = vector.broadcast %13 : vector<8x1xf32> to vector<8x128xf32>
    %16 = vector.broadcast %14 : vector<1x128xf32> to vector<8x128xf32>
    %17 = arith.mulf %15, %16 : vector<8x128xf32>
    %18 = arith.addf %12, %17 : vector<8x128xf32>
    %19 = vector.extract_strided_slice %0 {offsets = [0, 3], sizes = [8, 1], strides = [1, 1]} : vector<8x4xf32> to vector<8x1xf32>
    %20 = vector.extract_strided_slice %1 {offsets = [3, 0], sizes = [1, 128], strides = [1, 1]} : vector<4x128xf32> to vector<1x128xf32>
    %21 = vector.broadcast %19 : vector<8x1xf32> to vector<8x128xf32>
    %22 = vector.broadcast %20 : vector<1x128xf32> to vector<8x128xf32>
    %23 = arith.mulf %21, %22 : vector<8x128xf32>
    %24 = arith.addf %18, %23 : vector<8x128xf32>
    %c0_3 = arith.constant 0 : index
    %c0_4 = arith.constant 0 : index
    %25 = vector.load %arg3[%c0_3, %c0_4] : memref<1x128xf32, #tpu.memory_space<vmem>>, vector<1x128xf32>
    %26 = vector.broadcast %25 : vector<1x128xf32> to vector<8x128xf32>
    %27 = arith.addf %24, %26 : vector<8x128xf32>
    %cst = arith.constant 0.000000e+00 : f32
    %28 = vector.broadcast %cst : f32 to vector<8x128xf32>
    %29 = arith.maximumf %27, %28 : vector<8x128xf32>
    %c0_5 = arith.constant 0 : index
    %c0_6 = arith.constant 0 : index
    %30 = vector.load %arg4[%c0_5, %c0_6] : memref<128x64xf32, #tpu.memory_space<vmem>>, vector<128x64xf32>
    %cst_7 = arith.constant dense<0.000000e+00> : vector<8x64xf32>
    %31 = tpu.matmul %29, %30, %cst_7 {dimension_numbers = #tpu.dot_dimension_numbers<[1], [0], [0], [1], [0, 0, 1, 1], [], []>} : vector<8x128xf32>, vector<128x64xf32>, vector<8x64xf32> -> vector<8x64xf32>
    %c0_8 = arith.constant 0 : index
    %c0_9 = arith.constant 0 : index
    %32 = vector.load %arg5[%c0_8, %c0_9] : memref<1x64xf32, #tpu.memory_space<vmem>>, vector<1x64xf32>
    %33 = vector.broadcast %32 : vector<1x64xf32> to vector<8x64xf32>
    %34 = arith.addf %31, %33 : vector<8x64xf32>
    %cst_10 = arith.constant 0.000000e+00 : f32
    %35 = vector.broadcast %cst_10 : f32 to vector<8x64xf32>
    %36 = arith.maximumf %34, %35 : vector<8x64xf32>
    %c0_11 = arith.constant 0 : index
    %c0_12 = arith.constant 0 : index
    %37 = vector.load %arg6[%c0_11, %c0_12] : memref<64x2xf32, #tpu.memory_space<vmem>>, vector<64x2xf32>
    %cst_13 = arith.constant dense<0.000000e+00> : vector<8x2xf32>
    %38 = tpu.matmul %36, %37, %cst_13 {dimension_numbers = #tpu.dot_dimension_numbers<[1], [0], [0], [1], [0, 0, 1, 1], [], []>} : vector<8x64xf32>, vector<64x2xf32>, vector<8x2xf32> -> vector<8x2xf32>
    %c0_14 = arith.constant 0 : index
    %c0_15 = arith.constant 0 : index
    %39 = vector.load %arg7[%c0_14, %c0_15] : memref<1x2xf32, #tpu.memory_space<vmem>>, vector<1x2xf32>
    %40 = vector.broadcast %39 : vector<1x2xf32> to vector<8x2xf32>
    %41 = arith.addf %38, %40 : vector<8x2xf32>
    %c0_16 = arith.constant 0 : index
    %c0_17 = arith.constant 0 : index
    %42 = vector.load %arg8[%c0_16, %c0_17] : memref<8x2xf32, #tpu.memory_space<vmem>>, vector<8x2xf32>
    tpu.vector_store %arg8[%c0_16, %c0_17], %41 {strides = array<i32>} : memref<8x2xf32, #tpu.memory_space<vmem>>, vector<8x2xf32>,
    return
  }
  func.func @transform_0(%arg0: i32) -> (i32, i32) {
    %c0_i32 = arith.constant 0 : i32
    %c0_i32_0 = arith.constant 0 : i32
    return %arg0, %c0_i32 : i32, i32
  }
  func.func @transform_1(%arg0: i32) -> (i32, i32) {
    %c0_i32 = arith.constant 0 : i32
    %c0_i32_0 = arith.constant 0 : i32
    %c0_i32_1 = arith.constant 0 : i32
    return %c0_i32, %c0_i32_0 : i32, i32
  }
  func.func @transform_2(%arg0: i32) -> (i32, i32) {
    %c0_i32 = arith.constant 0 : i32
    %c0_i32_0 = arith.constant 0 : i32
    %c0_i32_1 = arith.constant 0 : i32
    return %c0_i32, %c0_i32_0 : i32, i32
  }
  func.func @transform_3(%arg0: i32) -> (i32, i32) {
    %c0_i32 = arith.constant 0 : i32
    %c0_i32_0 = arith.constant 0 : i32
    %c0_i32_1 = arith.constant 0 : i32
    return %c0_i32, %c0_i32_0 : i32, i32
  }
  func.func @transform_4(%arg0: i32) -> (i32, i32) {
    %c0_i32 = arith.constant 0 : i32
    %c0_i32_0 = arith.constant 0 : i32
    %c0_i32_1 = arith.constant 0 : i32
    return %c0_i32, %c0_i32_0 : i32, i32
  }
  func.func @transform_5(%arg0: i32) -> (i32, i32) {
    %c0_i32 = arith.constant 0 : i32
    %c0_i32_0 = arith.constant 0 : i32
    %c0_i32_1 = arith.constant 0 : i32
    return %c0_i32, %c0_i32_0 : i32, i32
  }
  func.func @transform_6(%arg0: i32) -> (i32, i32) {
    %c0_i32 = arith.constant 0 : i32
    %c0_i32_0 = arith.constant 0 : i32
    %c0_i32_1 = arith.constant 0 : i32
    return %c0_i32, %c0_i32_0 : i32, i32
  }
  func.func @transform_7(%arg0: i32) -> (i32, i32) {
    %c0_i32 = arith.constant 0 : i32
    %c0_i32_0 = arith.constant 0 : i32
    return %arg0, %c0_i32 : i32, i32
  }
}

</mosaic_0001>

<bundles_post_ra>
// kernel: tpu_custom_call.1
= control target key start
LH: loop header
LB: loop body
LE: loop exit
PB: predicated region body
PF: predicated region fallthrough
CT: control target
= control target key end

     0   :  { %v398_v0 = vmov 0   ;;  %v399_v2 = vmov 2   ;;  %v400_v8 = vmov 0.0|0.0   ;;  %v401_v12 = vmov 1   ;;  %s535_s0 = inlined_call_operand.vmem [shape: f32[8,4], index: 0, kind: input, shape index: {}]   ;;  %s536_s3 = inlined_call_operand.vmem [shape: f32[128,64], index: 3, kind: input, shape index: {}]   ;;  %s537_s5 = inlined_call_operand.vmem [shape: f32[64,2], index: 5, kind: input, shape index: {}]   ;;  %s538_s1 = inlined_call_operand.vmem [shape: f32[4,128], index: 1, kind: input, shape index: {}]   ;;  %s539_s2 = inlined_call_operand.vmem [shape: f32[1,128], index: 2, kind: input, shape index: {}]   ;;  %s540_s4 = inlined_call_operand.vmem [shape: f32[1,64], index: 4, kind: input, shape index: {}]   ;;  %s541_s6 = inlined_call_operand.vmem [shape: f32[1,2], index: 6, kind: input, shape index: {}]   ;;  %s542_s7 = inlined_call_operand.vmem [shape: f32[8,2], index: 7, kind: output, shape index: {}]  }
   0x1   :  { %393 = vset.pattern.permute.xlu0 %v398_v0  ;;  %v26_v1 = vld [vmem:[%s535_s0] sm:$0xff]  ;;  %395 = vset.pattern.permute.xlu1 %v399_v2  ;;  %v78_v4 = vld [vmem:[%s536_s3 + $0x8] sm:$0xff]  ;;  %v79_v6 = vld [vmem:[%s536_s3 + $0x10] sm:$0xff]  ;;  %v402_v13 = vmov 3   ;;  %vm403_vm0 = vmmov 0   ;;  %v404_v20 = vmov 0.0   ;;  %v33_v40 = vlaneseq }
   0x2   :  { %v77_v3 = vld [vmem:[%s536_s3] sm:$0xff]  ;;  %30 = vperm.xlu0 %393, %v26_v1   ;;  %49 = vperm.xlu1 %395, %v26_v1   ;;  %v80_v7 = vld [vmem:[%s536_s3 + $0x18] sm:$0xff]  ;;  %v82_v11 = vld [vmem:[%s536_s3 + $0x28] sm:$0xff]  ;;  %vm186_vm1 = vcmask 523264   ;;  %vm260_vm2 = vcmask 15360  }
   0x3   :  { %v351_v5 = vpack.c.bf16 %v78_v4, %v77_v3  ;;  %350 = vmatprep.subr.bf16.mxu0 %v400_v8  ;;  %374 = vmatprep.subr.bf16.mxu1 %v400_v8  ;;  %v354_v9 = vpack.c.bf16 %v80_v7, %v79_v6  ;;  %v81_v10 = vld [vmem:[%s536_s3 + $0x20] sm:$0xff]  ;;  %v83_v15 = vld [vmem:[%s536_s3 + $0x30] sm:$0xff]  ;;  %v84_v16 = vld [vmem:[%s536_s3 + $0x38] sm:$0xff]  ;;  %v34_v41 = vshrl.u32 %v33_v40, 7 }
   0x4   :  { %v357_v14 = vpack.c.bf16 %v82_v11, %v81_v10  ;;  %v360_v17 = vpack.c.bf16 %v84_v16, %v83_v15  ;;  %v85_v18 = vld [vmem:[%s536_s3 + $0x40] sm:$0xff]  ;;  %v86_v19 = vld [vmem:[%s536_s3 + $0x48] sm:$0xff]  ;;  %328 = vmatprep.mubr.msk.f32.mxu0 %vm403_vm0, %v404_v20  ;;  %347 = vmatprep.mubr.msk.f32.mxu1 %vm403_vm0, %v404_v20  ;;  %v87_v22 = vld [vmem:[%s536_s3 + $0x50] sm:$0xff] }
   0x5   :  { %352 = vmatpush3.bf16.msra.mxu0 %v351_v5  ;;  %v363_v21 = vpack.c.bf16 %v86_v19, %v85_v18  ;;  %v88_v23 = vld [vmem:[%s536_s3 + $0x58] sm:$0xff]  ;;  %v171_v25 = vld [vmem:[%s537_s5] sm:$0xff]  ;;  %v172_v26 = vld [vmem:[%s537_s5 + $0x8] sm:$0xff]  ;;  %v35_v42 = vsub.s32 0, %v34_v41  ;;  %v44_v43 = vsub.s32 1, %v34_v41  ;;  %v54_v46 = vsub.s32 2, %v34_v41 }
   0x6   :  { %353 = vmatprep.subr.bf16.mxu0 %v400_v8  ;;  %394 = vset.pattern.permute.xlu0 %v401_v12  ;;  %v366_v24 = vpack.c.bf16 %v88_v23, %v87_v22  ;;  %v173_v27 = vld [vmem:[%s537_s5 + $0x10] sm:$0xff]  ;;  %v89_v28 = vld [vmem:[%s536_s3 + $0x60] sm:$0xff]  ;;  %v90_v29 = vld [vmem:[%s536_s3 + $0x68] sm:$0xff]  ;;  %v375_v30 = vpack.c.bf16 %v172_v26, %v171_v25  ;;  %v64_v48 = vsub.s32 3, %v34_v41 }
   0x7   :  { %396 = vset.pattern.permute.xlu1 %v402_v13  ;;  %39 = vperm.xlu0 %394, %v26_v1   ;;  %v174_v31 = vld [vmem:[%s537_s5 + $0x18] sm:$0xff]  ;;  %v369_v33 = vpack.c.bf16 %v90_v29, %v89_v28  ;;  %v175_v34 = vld [vmem:[%s537_s5 + $0x20] sm:$0xff]  ;;  %v176_v35 = vld [vmem:[%s537_s5 + $0x28] sm:$0xff] }
   0x8   :  { %59 = vperm.xlu1 %396, %v26_v1   ;;  %376 = vmatpush3.bf16.msra.mxu1 %v375_v30  ;;  %v378_v32 = vpack.c.bf16 %v174_v31, %v173_v27  ;;  %v91_v36 = vld [vmem:[%s536_s3 + $0x70] sm:$0xff]  ;;  %v92_v37 = vld [vmem:[%s536_s3 + $0x78] sm:$0xff]  ;;  %v381_v38 = vpack.c.bf16 %v176_v35, %v175_v34  ;;  %v27_v44 = vld [vmem:[%s538_s1] sm:$0xf] }
   0x9   :  { %355 = vmatpush3.bf16.msra.mxu0 %v354_v9  ;;  %377 = vmatprep.subr.bf16.mxu1 %v400_v8  ;;  %v372_v39 = vpack.c.bf16 %v92_v37, %v91_v36  ;;  %v36_v49 = vrot.slane %v27_v44, %v35_v42  ;;  %v45_v50 = vrot.slane %v27_v44, %v44_v43  ;;  %v266_v61 = vld [vmem:[%s539_s2] ss:$0 sm:$0xff]  ;;  %v177_v1 = vld [vmem:[%s537_s5 + $0x30] sm:$0xff]  ;;  %v178_v2 = vld [vmem:[%s537_s5 + $0x38] sm:$0xff] }
   0xa   :  { %356 = vmatprep.subr.bf16.mxu0 %v400_v8  ;;  %v55_v51 = vrot.slane %v27_v44, %v54_v46  ;;  %v65_v52 = vrot.slane %v27_v44, %v64_v48  ;;  %v384_v3 = vpack.c.bf16 %v178_v2, %v177_v1  ;;  %v267_v4 = vld [vmem:[%s540_s4] ss:$0 sm:$0xff] }
   0xb   :  { %397 = vset.pattern.permute.xlu0 %v402_v13  ;;  %v268_v9 = vld [vmem:[%s541_s6] ss:$0 sm:$0xff] }
   0xc   :  { %379 = vmatpush3.bf16.msra.mxu1 %v378_v32 }
   0xd   :  { %358 = vmatpush3.bf16.msra.mxu0 %v357_v14  ;;  %380 = vmatprep.subr.bf16.mxu1 %v400_v8 }
   0xe   :  { %359 = vmatprep.subr.bf16.mxu0 %v400_v8 }
  0x10   :  { %382 = vmatpush3.bf16.msra.mxu1 %v381_v38 }
  0x11   :  { %361 = vmatpush3.bf16.msra.mxu0 %v360_v17  ;;  %383 = vmatprep.subr.bf16.mxu1 %v400_v8 }
  0x12   :  { %362 = vmatprep.subr.bf16.mxu0 %v400_v8 }
  0x14   :  { %385 = vmatpush3.bf16.msra.mxu1 %v384_v3 }
  0x15   :  { %364 = vmatpush3.bf16.msra.mxu0 %v363_v21 }
  0x16   :  { %365 = vmatprep.subr.bf16.mxu0 %v400_v8 }
  0x19   :  { %367 = vmatpush3.bf16.msra.mxu0 %v366_v24 }
  0x1a   :  { %368 = vmatprep.subr.bf16.mxu0 %v400_v8 }
  0x1d   :  { %370 = vmatpush3.bf16.msra.mxu0 %v369_v33 }
  0x1e   :  { %371 = vmatprep.subr.bf16.mxu0 %v400_v8 }
  0x21   :  { %373 = vmatpush3.bf16.msra.mxu0 %v372_v39 }
  0x81   :  { %v31_v45 = vpop.permute.xlu0 %30  ;;  %v50_v47 = vpop.permute.xlu1 %49 }
  0x82   :  { %v37_v55 = vmul.f32 %v36_v49, %v31_v45  ;;  %v56_v57 = vmul.f32 %v55_v51, %v50_v47 }
  0x86   :  { %v40_v53 = vpop.permute.xlu0 %39 }
  0x87   :  { %v60_v54 = vpop.permute.xlu1 %59  ;;  %v46_v56 = vmul.f32 %v45_v50, %v40_v53 }
  0x88   :  { %v66_v59 = vmul.f32 %v65_v52, %v60_v54 }
  0x89   :  { %v47_v58 = vadd.f32 %v46_v56, %v37_v55 }
  0x8b   :  { %v57_v60 = vadd.f32 %v56_v57, %v47_v58 }
  0x8d   :  { %v67_v62 = vadd.f32 %v66_v59, %v57_v60 }
  0x8f   :  { %v75_v63 = vadd.f32 %v266_v61, %v67_v62 }
  0x91   :  { %v76_v0 = vmax.f32 %v75_v63, 0.0 }
  0x93   :  { %329 = vmatmul.mubr.f32.vlgmr.msra.gmra.mrb[0].mxu0 %v76_v0 }
 0x166   :  { %v166_v5 = vpop.f32.mrb[0].mxu0 }
 0x167   :  { %v167_v6 = vadd.f32 %v267_v4, %v166_v5  ;;  %v330_v7 = vpop.f32.mrb[1].mxu0 }
 0x169   :  { %v170_v8 = vmax.f32 %v167_v6, 0.0 }
 0x16b   :  { %348 = vmatmul.mubr.msk.f32.vlgmr.msra.gmra.mrb[0].mxu1 %vm186_vm1, %v170_v8 }
 0x23e   :  { %v256_v10 = vpop.f32.mrb[0].mxu1 }
 0x23f   :  { %v257_v11 = vadd.f32 %v268_v9, %v256_v10  ;;  %v349_v12 = vpop.f32.mrb[1].mxu1 }
 0x241   :  { %261 = vst.msk [vmem:[%s542_s7] sm:$0xff] %vm260_vm2, %v257_v11 }

</bundles_post_ra>
